<compile_context>
chip_gen: v7x
topology: tpu7x:2x2x1
jax: 0.10.0
libtpu: 0.0.40
codegen_flags: <defaults>
</compile_context>

<pallas_src>
import jax
import jax.numpy as jnp
from jax import lax
from jax.experimental import pallas as pl
from jax.experimental.pallas import tpu as pltpu


# ----------------------------------------------------------------------------
# Parameter / posemb construction (plain JAX glue, deterministic)
# ----------------------------------------------------------------------------
def build_2d_sincos_posemb(h, w, embed_dim, temperature=10000.0):
    """Fixed 2D sin-cos positional embedding, shape (1, embed_dim, h, w)."""
    assert embed_dim % 4 == 0
    grid_w = jnp.arange(w, dtype=jnp.float32)
    grid_h = jnp.arange(h, dtype=jnp.float32)
    grid_w, grid_h = jnp.meshgrid(grid_w, grid_h, indexing="ij")
    pos_dim = embed_dim // 4
    omega = jnp.arange(pos_dim, dtype=jnp.float32) / pos_dim
    omega = 1.0 / (temperature ** omega)
    out_w = grid_w.reshape(-1)[:, None] * omega[None, :]
    out_h = grid_h.reshape(-1)[:, None] * omega[None, :]
    pos = jnp.concatenate(
        [jnp.sin(out_w), jnp.cos(out_w), jnp.sin(out_h), jnp.cos(out_h)], axis=1
    )  # (h*w, D)
    pos = pos.reshape(h, w, embed_dim)
    pos = jnp.transpose(pos, (2, 0, 1))[None]  # (1, D, h, w)
    return pos


def _cubic_weight(t, A=-0.75):
    """PyTorch-style bicubic convolution kernel (A = -0.75)."""
    at = jnp.abs(t)
    f1 = (A + 2.0) * at**3 - (A + 3.0) * at**2 + 1.0
    f2 = A * at**3 - 5.0 * A * at**2 + 8.0 * A * at - 4.0 * A
    return jnp.where(at <= 1.0, f1, jnp.where(at < 2.0, f2, 0.0))


def bicubic_resize_nchw(x, out_h, out_w):
    """F.interpolate(x, size=(out_h, out_w), mode='bicubic', align_corners=False)."""
    def resize_axis(arr, in_size, out_size, axis):
        if in_size == out_size:
            return arr  # exact identity (sample positions land on integers)
        scale = in_size / out_size
        i = jnp.arange(out_size, dtype=jnp.float32)
        src = (i + 0.5) * scale - 0.5
        i0 = jnp.floor(src).astype(jnp.int32)
        t = src - i0.astype(jnp.float32)
        taps = [i0 - 1, i0, i0 + 1, i0 + 2]
        wts = [_cubic_weight(t + 1.0), _cubic_weight(t),
               _cubic_weight(1.0 - t), _cubic_weight(2.0 - t)]
        out = 0.0
        for idx, wk in zip(taps, wts):
            idx = jnp.clip(idx, 0, in_size - 1)
            g = jnp.take(arr, idx, axis=axis)
            shape = [1] * arr.ndim
            shape[axis] = out_size
            out = out + g * wk.reshape(shape)
        return out

    _, _, H, W = x.shape
    x = resize_axis(x, H, out_h, 2)
    x = resize_axis(x, W, out_w, 3)
    return x


def _round_up(x, m):
    return (x + m - 1) // m * m


# ----------------------------------------------------------------------------
# Pallas kernel: patch matmul + fused (pos + bias) epilogue add
# ----------------------------------------------------------------------------
def _patch_embed_kernel(x_ref, w_ref, pb_ref, o_ref):
    # x_ref: (TN, K) bf16/f32, w_ref: (K, D) bf16/f32, pb_ref: (TN, D) f32
    acc = jnp.dot(x_ref[...], w_ref[...], preferred_element_type=jnp.float32)
    o_ref[...] = (acc + pb_ref[...]).astype(o_ref.dtype)


_VMEM_LIMIT_BYTES = 48 * 1024 * 1024       # scoped limit, safe on v5e/v6e/v7x
_VMEM_TILE_BUDGET = 24 * 1024 * 1024       # target double-buffered per-step footprint


def _pick_row_tile(N, K, D, in_bytes, out_bytes, tile_n):
    """Token-axis row tile: big for HBM roofline, small enough for VMEM, and
    >=2 steps along the (parallel) token axis when possible (v7x megacore)."""
    if tile_n >= N:
        TN = N                               # full extent: exempt from 8-divisibility
    else:
        TN = max(8, (tile_n // 8) * 8)
    if N >= 16 and pl.cdiv(N, TN) < 2:       # keep both v7x TensorCores busy
        TN = _round_up(pl.cdiv(N, 2), 8)

    def footprint(tn):
        return (2 * tn * K * in_bytes        # patch tile (double-buffered)
                + 2 * K * D * in_bytes       # weight
                + 2 * tn * D * 4             # pos + bias (f32)
                + 2 * tn * D * out_bytes)    # output tile

    while TN > 8 and footprint(TN) > _VMEM_TILE_BUDGET:
        TN = _round_up(TN // 2, 8)
    return TN


def patched_input_adapter_forward(x, conv_w, conv_b, pos_emb_nchw, P_H, P_W,
                                  *, use_bf16=True, tile_n=512, out_dtype=None):
    """Pallas equivalent of PatchedInputAdapter.forward.

    x:            (B, C, H, W)       NCHW input
    conv_w:       (D, C, P_H, P_W)   Conv2d weight (OIHW)
    conv_b:       (D,)
    pos_emb_nchw: (1, D, h_posemb, w_posemb)
    returns:      (B, N_H*N_W, D) tokens (dtype = out_dtype or x.dtype)
    """
    B, C, H, W = x.shape
    D = conv_w.shape[0]
    assert H % P_H == 0 and W % P_W == 0
    N_H, N_W = H // P_H, W // P_W
    N = N_H * N_W
    K = C * P_H * P_W
    out_dtype = x.dtype if out_dtype is None else out_dtype
    in_dtype = jnp.bfloat16 if use_bf16 else x.dtype

    # --- glue: patchify (b, c, nh*ph, nw*pw) -> (B, N, K) in (c, ph, pw) order,
    # matching the OIHW conv-weight flatten order.  Cast to bf16 *before* the
    # transpose so the XLA-side reshuffle moves half the bytes.
    # TODO(synk): fuse this HBM-level patchify transpose into the kernel with a
    # manual DMA gather (memory_space=pl.ANY) to avoid an extra full read+write
    # of x at large resolutions.
    xp = x.astype(in_dtype).reshape(B, C, N_H, P_H, N_W, P_W)
    xp = jnp.transpose(xp, (0, 2, 4, 1, 3, 5)).reshape(B, N, K)
    wm = conv_w.reshape(D, K).T.astype(in_dtype)               # (K, D)

    # --- glue: bicubic-resize posemb to (N_H, N_W), rearrange to (N, D) and
    # fold the conv bias into it.  Kept at (N, D) — NOT tiled over the batch.
    pos = bicubic_resize_nchw(pos_emb_nchw.astype(jnp.float32), N_H, N_W)
    pos = jnp.transpose(pos[0], (1, 2, 0)).reshape(N, D)       # 'd nh nw -> (nh nw) d'
    posb = pos + conv_b.astype(jnp.float32)[None, :]           # (N, D)

    in_bytes = jnp.dtype(in_dtype).itemsize
    out_bytes = jnp.dtype(out_dtype).itemsize
    TN = _pick_row_tile(N, K, D, in_bytes, out_bytes, tile_n)
    n_tiles = pl.cdiv(N, TN)

    # Grid: token tiles outermost, batch innermost.  The posb block index
    # (j, 0) is constant across the inner loop -> each posb tile is DMA'd from
    # HBM exactly once; the weight (constant index) is DMA'd once total.
    grid = (n_tiles, B)

    out = pl.pallas_call(
        _patch_embed_kernel,
        out_shape=jax.ShapeDtypeStruct((B, N, D), out_dtype),
        grid_spec=pltpu.PrefetchScalarGridSpec(
            num_scalar_prefetch=0,
            grid=grid,
            in_specs=[
                pl.BlockSpec((None, TN, K), lambda j, b: (b, j, 0)),   # patches
                pl.BlockSpec((K, D), lambda j, b: (0, 0)),             # weight
                pl.BlockSpec((TN, D), lambda j, b: (j, 0)),            # pos + bias
            ],
            out_specs=pl.BlockSpec((None, TN, D), lambda j, b: (b, j, 0)),
        ),
        compiler_params=pltpu.CompilerParams(
            dimension_semantics=("parallel", "parallel"),
            vmem_limit_bytes=_VMEM_LIMIT_BYTES,
        ),
        cost_estimate=pl.CostEstimate(
            flops=2 * B * N * K * D,
            transcendentals=0,
            bytes_accessed=(B * N * K * in_bytes + K * D * in_bytes
                            + N * D * 4 + B * N * D * out_bytes),
        ),
    )(xp, wm, posb)
    return out


# ----------------------------------------------------------------------------
# Reference (plain JAX, mirrors the PyTorch forward) for verification
# ----------------------------------------------------------------------------
def reference_forward(x, conv_w, conv_b, pos_emb_nchw, P_H, P_W):
    B, C, H, W = x.shape
    D = conv_w.shape[0]
    N_H, N_W = H // P_H, W // P_W
    y = lax.conv_general_dilated(
        x, conv_w, window_strides=(P_H, P_W), padding="VALID",
        dimension_numbers=("NCHW", "OIHW", "NCHW"),
    ) + conv_b[None, :, None, None]
    x_patch = jnp.transpose(y, (0, 2, 3, 1)).reshape(B, N_H * N_W, D)
    pos = bicubic_resize_nchw(pos_emb_nchw, N_H, N_W)
    pos = jnp.transpose(pos[0], (1, 2, 0)).reshape(N_H * N_W, D)
    return x_patch + pos[None]


if __name__ == "__main__":
    # Module config: num_channels=4, stride_level=1, patch_size_full=4,
    # dim_tokens=128, image_size=16  ->  P_H=P_W=4, h_posemb=w_posemb=4
    B, C, H, W = 2, 4, 16, 16
    P_H = P_W = 4
    D = 128
    stride_level = 1
    image_size = (16, 16)
    h_posemb = image_size[0] // (stride_level * P_H)
    w_posemb = image_size[1] // (stride_level * P_W)

    key = jax.random.PRNGKey(0)
    kx, kw, kb = jax.random.split(key, 3)
    x = jax.random.normal(kx, (B, C, H, W), dtype=jnp.float32)
    conv_w = 0.02 * jax.random.normal(kw, (D, C, P_H, P_W), dtype=jnp.float32)
    conv_b = 0.01 * jax.random.normal(kb, (D,), dtype=jnp.float32)
    pos_emb = build_2d_sincos_posemb(h_posemb, w_posemb, D)  # sincos_pos_emb=True

    out = patched_input_adapter_forward(x, conv_w, conv_b, pos_emb, P_H, P_W)
    out = jax.block_until_ready(out)

    ref = reference_forward(x, conv_w, conv_b, pos_emb, P_H, P_W)
    assert out.shape == (B, (H // P_H) * (W // P_W), D)
    # bf16 MXU operands -> loose tolerance vs. the full-f32 reference.
    assert jnp.allclose(out, ref, atol=2e-2, rtol=2e-2), (
        float(jnp.max(jnp.abs(out - ref)))
    )
    # Also verify the pure-f32 kernel path matches tightly.
    out_f32 = patched_input_adapter_forward(
        x, conv_w, conv_b, pos_emb, P_H, P_W, use_bf16=False)
    out_f32 = jax.block_until_ready(out_f32)
    assert jnp.allclose(out_f32, ref, atol=1e-4, rtol=1e-4), (
        float(jnp.max(jnp.abs(out_f32 - ref)))
    )
    print("KERNEL_OK")
</pallas_src>

<mosaic_0001>
module attributes {stable_mosaic.version = 11 : i64} {
  func.func @_patch_embed_kernel(%arg0: i32, %arg1: i32, %arg2: memref<1x8x64xbf16, #tpu.memory_space<vmem>>, %arg3: memref<64x128xbf16, #tpu.memory_space<vmem>>, %arg4: memref<8x128xf32, #tpu.memory_space<vmem>>, %arg5: memref<1x8x128xf32, #tpu.memory_space<vmem>>) attributes {dimension_semantics = [#tpu.dimension_semantics<parallel>, #tpu.dimension_semantics<parallel>], iteration_bounds = array<i64: 2, 2>, scalar_prefetch = 0 : i64, scratch_operands = 0 : i64, tpu.core_type = #tpu.core_type<tc>, window_params = [{transform_indices = @transform_0, window_bounds = array<i64: 1, 8, 64>}, {pipeline_mode = #tpu.pipeline_mode<synchronous>, transform_indices = @transform_1, window_bounds = array<i64: 64, 128>}, {transform_indices = @transform_2, window_bounds = array<i64: 8, 128>}, {transform_indices = @transform_3, window_bounds = array<i64: 1, 8, 128>}]} {
    %c0 = arith.constant 0 : index
    %c0_0 = arith.constant 0 : index
    %c0_1 = arith.constant 0 : index
    %0 = vector.load %arg2[%c0, %c0_0, %c0_1] : memref<1x8x64xbf16, #tpu.memory_space<vmem>>, vector<1x8x64xbf16>
    %1 = vector.shape_cast %0 : vector<1x8x64xbf16> to vector<8x64xbf16>
    %c0_2 = arith.constant 0 : index
    %c0_3 = arith.constant 0 : index
    %2 = vector.load %arg3[%c0_2, %c0_3] : memref<64x128xbf16, #tpu.memory_space<vmem>>, vector<64x128xbf16>
    %cst = arith.constant dense<0.000000e+00> : vector<8x128xf32>
    %3 = tpu.matmul %1, %2, %cst {dimension_numbers = #tpu.dot_dimension_numbers<[1], [0], [0], [1], [0, 0, 1, 1], [], []>} : vector<8x64xbf16>, vector<64x128xbf16>, vector<8x128xf32> -> vector<8x128xf32>
    %c0_4 = arith.constant 0 : index
    %c0_5 = arith.constant 0 : index
    %4 = vector.load %arg4[%c0_4, %c0_5] : memref<8x128xf32, #tpu.memory_space<vmem>>, vector<8x128xf32>
    %5 = arith.addf %3, %4 : vector<8x128xf32>
    %c0_6 = arith.constant 0 : index
    %c0_7 = arith.constant 0 : index
    %c0_8 = arith.constant 0 : index
    %6 = vector.load %arg5[%c0_6, %c0_7, %c0_8] : memref<1x8x128xf32, #tpu.memory_space<vmem>>, vector<1x8x128xf32>
    %7 = vector.shape_cast %6 : vector<1x8x128xf32> to vector<8x128xf32>
    %8 = vector.shape_cast %5 : vector<8x128xf32> to vector<1x8x128xf32>
    tpu.vector_store %arg5[%c0_6, %c0_7, %c0_8], %8 {strides = array<i32>} : memref<1x8x128xf32, #tpu.memory_space<vmem>>, vector<1x8x128xf32>,
    return
  }
  func.func @transform_0(%arg0: i32, %arg1: i32) -> (i32, i32, i32) {
    %c0_i32 = arith.constant 0 : i32
    %c0_i32_0 = arith.constant 0 : i32
    return %arg1, %arg0, %c0_i32 : i32, i32, i32
  }
  func.func @transform_1(%arg0: i32, %arg1: i32) -> (i32, i32) {
    %c0_i32 = arith.constant 0 : i32
    %c0_i32_0 = arith.constant 0 : i32
    %c0_i32_1 = arith.constant 0 : i32
    return %c0_i32, %c0_i32_0 : i32, i32
  }
  func.func @transform_2(%arg0: i32, %arg1: i32) -> (i32, i32) {
    %c0_i32 = arith.constant 0 : i32
    %c0_i32_0 = arith.constant 0 : i32
    return %arg0, %c0_i32 : i32, i32
  }
  func.func @transform_3(%arg0: i32, %arg1: i32) -> (i32, i32, i32) {
    %c0_i32 = arith.constant 0 : i32
    %c0_i32_0 = arith.constant 0 : i32
    return %arg1, %arg0, %c0_i32 : i32, i32, i32
  }
}

</mosaic_0001>

<bundles_post_ra>
// kernel: tpu_custom_call.1
= control target key start
LH: loop header
LB: loop body
LE: loop exit
PB: predicated region body
PF: predicated region fallthrough
CT: control target
= control target key end

     0   :  { %s1211_s0 = inlined_call_operand.hbm [shape: bf16[2,16,64], index: 0, kind: input, shape index: {}]   ;;  %s1212_s1 = inlined_call_operand.hbm [shape: bf16[64,128], index: 1, kind: input, shape index: {}]   ;;  %s1213_s2 = inlined_call_operand.hbm [shape: f32[16,128], index: 2, kind: input, shape index: {}]   ;;  %s1214_s3 = inlined_call_operand.hbm [shape: f32[2,16,128], index: 3, kind: output, shape index: {}]  }
   0x1   :  { %1229 = sst [smem:[#allocation18_spill]] %s1211_s0 }
   0x2   :  { %1230 = sst [smem:[#allocation19_spill]] %s1214_s3 }
   0x3   :  { %8 = vsyncpa [#allocation3], 0 }
   0x4   :  { %10 = vsyncpa [#allocation3 + $0x1], 0 }
   0x5   :  { %11 = vsyncpa [#allocation6], 0 }
   0x6   :  { %12 = vsyncpa [#allocation4], 0 }
   0x7   :  { %14 = vsyncpa [#allocation4 + $0x1], 0  ;;  %s880_s12 = smov 0   ;;  %s882_s13 = smov 0  }
   0x8   :  { %s884_s14 = smov 0   ;;  %s886_s15 = smov 0  }
   0x9   :  { %s888_s16 = smov 0   ;;  %s890_s17 = smov 0  }
   0xa   :  { %s892_s18 = smov 0   ;;  %s894_s19 = smov 0  }
   0xb   :  { %s896_s20 = smov 0   ;;  %s898_s21 = smov 0  }
   0xc   :  { %s900_s22 = smov 0  }
   0xd LB: > { %1231 = sst [smem:[#allocation13_spill]] %s838_s19  ;;  %s936_s23 = sadd.s32 4294967295, %s850_s22   ;;  %s850_s22 = sphi %s900_s22, %s20_s22   ;;  %s846_s21 = sphi %s898_s21, %s1273_s21   ;;  %s842_s20 = sphi %s896_s20, %s1272_s20   ;;  %s838_s19 = sphi %s894_s19, %s1271_s19   ;;  %s834_s18 = sphi %s892_s18, %s1270_s18   ;;  %s830_s17 = sphi %s890_s17, %s1269_s17   ;;  %s826_s16 = sphi %s888_s16, %s1268_s16   ;;  %s822_s15 = sphi %s886_s15, %s1267_s15   ;;  %s818_s14 = sphi %s884_s14, %s1266_s14   ;;  %s814_s13 = sphi %s882_s13, %s1265_s13   ;;  %s810_s12 = sphi %s880_s12, %s1264_s12  }
   0xe   : > { %s465_s24 = sadd.s32 4294967294, %s850_s22   ;;  %s29_s25 = sadd.s32 1, %s842_s20 }
   0xf   : > { %s32_s26 = sadd.s32 1, %s846_s21  ;;  %p30_p0 = scmp.ge.s32.totalorder %s29_s25, 2 }
  0x10   : > { %s41_s27 = sadd.s32 1, %s830_s17  ;;  %p48_p1 = scmp.ne.s32.totalorder %s830_s17, %s826_s16 }
  0x11   : > { %p1222_p2 = scmp.eq.s32.totalorder %s850_s22, 0  ;;  %s1275_s25 = smov (%p30_p0, %s29_s25), 0 }
  0x12   : > { %1232 = sst [smem:[#allocation14_spill]] %s1275_s25  ;;  %s1277_s26 = smov (!%p30_p0, %s32_s26), %s846_s21 }
  0x13   : > { %s36_s28 = ssub.s32 %s842_s20, %s1275_s25  ;;  %p952_p3 = por %p1222_p2, %p48_p1 }
  0x14   : > { %p34_p4 = scmp.ge.s32.totalorder %s1277_s26, 2  ;;  %p1223_p5 = scmp.ne.s32.totalorder %s826_s16, %s822_s15 }
  0x15   : > { %p127_p6 = scmp.eq.s32.totalorder %s936_s23, 3  ;;  %p133_p7 = scmp.eq.s32.totalorder %s465_s24, 3 }
  0x16   : > { %s1279_s26 = smov (%p34_p4, %s1277_s26), 0  ;;  %p1221_p12 = scmp.lt.s32.totalorder %s850_s22, 4 }
  0x17   : > { %1234 = sst [smem:[#allocation15_spill]] %s1279_s26  ;;  %p961_p8 = por %p127_p6, %p48_p1 }
  0x18   : > { %p968_p9 = por %p133_p7, %p1223_p5  ;;  %s974_s5 = ssub.s32 %s846_s21, %s1279_s26 }
  0x19   : > { %s1235_s30 = scalar_select %p961_p8, 1, 0 }
  0x1a   : > { %s1237_s4 = scalar_select %p968_p9, 1, 0 }
  0x1b   : > { %1236 = sst [smem:[#allocation16_spill]] %s1235_s30  ;;  %s38_s6 = sor.u32 %s974_s5, %s36_s28 }
  0x1c   : > { %1238 = sst [smem:[#allocation17_spill]] %s1237_s4  ;;  %p39_p11 = scmp.eq.s32.totalorder %s38_s6, 0 }
  0x1d   : > { %s166_s7 = sand.u32 1, %s850_s22   ;;  %s168_s9 = sand.u32 1, %s830_s17  }
  0x1e   : > { %s981_s8 = scalar_select %p39_p11, %s830_s17, %s41_s27  }
  0x1f   : > { %s469_s10 = sshll.u32 %s168_s9, 2  ;;  %s470_s11 = sshll.u32 %s842_s20, 1 }
  0x20   : > { %s175_s24 = sadd.s32 %s846_s21, %s470_s11  ;;  %s170_s3 = scalar_lea.vmem [#allocation2], %s469_s10 }
  0x21   : > { %s471_s25 = sshll.u32 %s175_s24, 6  ;;  %s179_s4 = sshll.u32 %s170_s3, 4  ;;  %s991_s4 = int_to_ptr.vmem [resolvable:$true] %s179_s4 }
  0x22   : > { %s1239_s0 = sld [smem:[#allocation18_spill]]  ;;  %p997_p13 = pnand %p1221_p12, %p952_p3 }
  0x23   : > { %s1001_s3 = scalar_lea.sflag [#allocation3], %s166_s7 }
  0x24   : > { %p634_p1 = pneg %p997_p13 }
  0x28   : > { %s989_s19 = scalar_lea.hbm %s1239_s0, %s471_s25  ;;  %s637_s29 = scalar_lea.hbm %s1239_s0, 256 }
  0x29   : > { %s632_s28 = scalar_lea.hbm %s989_s19, 64  ;;  %p638_p3 = scmp.lt.u32.totalorder %s989_s19, %s1239_s0 }
  0x2a   : > { %p633_p0 = scmp.ne.s32.totalorder %s989_s19, %s632_s28  ;;  %p639_p7 = scmp.lt.u32.totalorder %s637_s29, %s632_s28 }
  0x2b   : > { %p641_p12 = scmp.lt.u32.totalorder %s632_s28, %s989_s19 }
  0x2c   : > { %p635_p4 = pnand %p634_p1, %p633_p0  ;;  %p640_p11 = por %p639_p7, %p638_p3 }
  0x2e   : > { %p636_p6 = pneg %p635_p4  ;;  %p642_p2 = por %p641_p12, %p640_p11 }
  0x30   : > { %p643_p10 = pnand %p642_p2, %p636_p6 }
  0x32   : > { %646 = shalt.err (!%p643_p10)
}
  0x33   : > { %s647_s7 = scalar_lea.vmem %s991_s4, 64  ;;  %s852_s9 = smov [#allocation2]  }
  0x34   : > { %p648_p0 = scmp.ne.s32.totalorder %s991_s4, %s647_s7  ;;  %s652_s10 = sshll.u32 %s852_s9, 4  ;;  %s653_s10 = int_to_ptr.vmem [resolvable:$false] %s652_s10 }
  0x35   : > { %s654_s11 = scalar_lea.vmem %s653_s10, 128  ;;  %p655_p9 = scmp.lt.s32.totalorder %s991_s4, %s653_s10 }
  0x36   : > { %p650_p4 = pnand %p648_p0, %p634_p1  ;;  %p656_p3 = scmp.lt.s32.totalorder %s654_s11, %s647_s7 }
  0x38   : > { %p651_p5 = pneg %p650_p4  ;;  %p657_p7 = por %p656_p3, %p655_p9 }
  0x3a   : > { %p658_p12 = pnand %p657_p7, %p651_p5 }
  0x3c   : > { %661 = shalt.err (!%p658_p12)
}
  0x3d   : > { %523 = dma.hbm_to_vmem [thread:$0]  (!%p997_p13), %s989_s19, 64, %s991_s4, %s1001_s3  }
  0x3e   : > { %p1224_p2 = scmp.eq.s32.totalorder %s936_s23, 0  ;;  %p466_p10 = scmp.ge.s32.totalorder %s850_s22, 1 }
  0x3f   : > { %p140_p1 = scmp.lt.s32.totalorder %s850_s22, 5  ;;  %p1241_p9 = scmp.ne.s32.totalorder %s826_s16, %s822_s15 }
  0x40   : > { %s853_s27 = smov [#allocation5]   ;;  %s88_s4 = sadd.s32 1, %s818_s14 }
  0x41   : > { %p1037_p5 = por %p1224_p2, %p1241_p9  ;;  %s152_s28 = sshll.u32 %s853_s27, 4  ;;  %s153_s28 = int_to_ptr.vmem [resolvable:$true] %s152_s28 }
  0x42   : > { %p1041_p6 = pnand %p466_p10, %p140_p1  ;;  %s662_s30 = scalar_lea.hbm %s1212_s1, 512 }
  0x43   : > { %s1242_s24 = scalar_select %p1037_p5, 1, 0 }
  0x44   : > { %s1243_s25 = scalar_select %p1041_p6, 1, 0 }
  0x45   : > { %p516_p11 = pneg %p1041_p6  ;;  %p663_p0 = scmp.ne.s32.totalorder %s1212_s1, %s662_s30 }
  0x46   : > { %p669_p12 = scmp.lt.u32.totalorder %s662_s30, %s1212_s1 }
  0x47   : > { %p1049_p13 = pnand %p516_p11, %p1224_p2 }
  0x49   : > { %p664_p4 = pneg %p1049_p13 }
  0x4b   : > { %p665_p3 = pnand %p664_p4, %p663_p0 }
  0x4d   : > { %p666_p7 = pneg %p665_p3 }
  0x4f   : > { %p671_p10 = pnand %p669_p12, %p666_p7 }
  0x51   : > { %674 = shalt.err (!%p671_p10)
}
  0x52   : > { %s675_s11 = scalar_lea.vmem %s153_s28, 512  ;;  %p683_p2 = scmp.lt.s32.totalorder %s153_s28, %s153_s28 }
  0x53   : > { %p676_p1 = scmp.ne.s32.totalorder %s153_s28, %s675_s11  ;;  %p684_p8 = scmp.lt.s32.totalorder %s675_s11, %s675_s11 }
  0x55   : > { %p678_p9 = pnand %p676_p1, %p664_p4  ;;  %p685_p5 = por %p684_p8, %p683_p2 }
  0x57   : > { %p679_p11 = pneg %p678_p9 }
  0x59   : > { %p686_p6 = pnand %p685_p5, %p679_p11 }
  0x5b   : > { %689 = shalt.err (!%p686_p6)
}
  0x5c   : > { %s854_s27 = smov 64   ;;  %s855_s26 = smov 4  }
  0x5d   : > { %519 = dma.hbm_to_vmem [thread:$0]  (!%p1049_p13), %s1212_s1, 512, %s153_s28, [#allocation6], %s854_s27, %s854_s27, %s855_s26  }
  0x5e   : > { %p1245_p8 = scmp.eq.s32.totalorder %s974_s5, 0  ;;  %p95_p2 = scmp.ne.s32.totalorder %s818_s14, %s814_s13 }
  0x5f   : > { %p101_p5 = scmp.ne.s32.totalorder %s814_s13, %s810_s12  ;;  %s188_s7 = sand.u32 1, %s818_s14  }
  0x60   : > { %s1073_s6 = scalar_select %p1245_p8, %s818_s14, %s88_s4  }
  0x61   : > { %s473_s9 = sshll.u32 %s846_s21, 7  ;;  %p1246_p6 = scmp.eq.s32.totalorder %s850_s22, 0 }
  0x62   : > { %p1247_p4 = scmp.eq.s32.totalorder %s936_s23, 0  ;;  %s472_s11 = sshll.u32 %s188_s7, 3 }
  0x63   : > { %p97_p0 = por %p95_p2, %p1246_p6  ;;  %s1092_s29 = scalar_lea.hbm %s1213_s2, %s473_s9 }
  0x64   : > { %p1085_p3 = por %p101_p5, %p1247_p4  ;;  %p1249_p13 = scmp.lt.s32.totalorder %s850_s22, 4 }
  0x65   : > { %s190_s5 = scalar_lea.vmem [#allocation7], %s472_s11  ;;  %s690_s4 = scalar_lea.hbm %s1092_s29, 128 }
  0x66   : > { %s1248_s10 = scalar_select %p1085_p3, 1, 0 }
  0x67   : > { %p1096_p7 = pnand %p1249_p13, %p97_p0  ;;  %s197_s28 = sshll.u32 %s190_s5, 4  ;;  %s198_s28 = int_to_ptr.vmem [resolvable:$true] %s197_s28 }
  0x68   : > { %p691_p12 = scmp.ne.s32.totalorder %s1092_s29, %s690_s4  ;;  %s695_s26 = scalar_lea.hbm %s1213_s2, 256 }
  0x69   : > { %p692_p10 = pneg %p1096_p7  ;;  %p696_p11 = scmp.lt.u32.totalorder %s1092_s29, %s1213_s2 }
  0x6a   : > { %p697_p8 = scmp.lt.u32.totalorder %s695_s26, %s690_s4  ;;  %p699_p5 = scmp.lt.u32.totalorder %s690_s4, %s1092_s29 }
  0x6b   : > { %p693_p1 = pnand %p692_p10, %p691_p12 }
  0x6c   : > { %p698_p2 = por %p697_p8, %p696_p11 }
  0x6d   : > { %p694_p9 = pneg %p693_p1 }
  0x6e   : > { %p700_p6 = por %p699_p5, %p698_p2 }
  0x70   : > { %p701_p0 = pnand %p700_p6, %p694_p9 }
  0x72   : > { %704 = shalt.err (!%p701_p0)
}
  0x73   : > { %s705_s9 = scalar_lea.vmem %s198_s28, 128  ;;  %s856_s11 = smov [#allocation7]  }
  0x74   : > { %p706_p4 = scmp.ne.s32.totalorder %s198_s28, %s705_s9  ;;  %s710_s19 = sshll.u32 %s856_s11, 4  ;;  %s711_s19 = int_to_ptr.vmem [resolvable:$false] %s710_s19 }
  0x75   : > { %s712_s5 = scalar_lea.vmem %s711_s19, 256  ;;  %p713_p1 = scmp.lt.s32.totalorder %s198_s28, %s711_s19 }
  0x76   : > { %p708_p13 = pnand %p706_p4, %p692_p10  ;;  %p714_p3 = scmp.lt.s32.totalorder %s712_s5, %s705_s9 }
  0x78   : > { %p709_p12 = pneg %p708_p13  ;;  %p715_p8 = por %p714_p3, %p713_p1 }
  0x7a   : > { %p716_p11 = pnand %p715_p8, %p709_p12 }
  0x7c   : > { %719 = shalt.err (!%p716_p11)
}
  0x7d   : > { %526 = dma.hbm_to_vmem [thread:$0]  (!%p1096_p7), %s1092_s29, 128, %s198_s28, %s1001_s3  }
  0x7e   : > { %p1251_p9 = scmp.ne.s32.totalorder %s1243_s25, 0 }
  0x7f   : > { %s208_s4 = sand.u32 (!%p1251_p9), 1, %s936_s23   ;;  %s1126_s0 = sand.u32 (!%p1251_p9), 1, %s826_s16  }
  0x80   : > { %206 = sbr.rel (%p1251_p9) target bundleno = 388 (0x184), region = 32  ;;  %s475_s27 = sshll.u32 (!%p1251_p9), %s1126_s0, 2 }
  0x81   : > { %s209_s26 = scalar_lea.sflag (!%p1251_p9), [#allocation3], %s208_s4  ;;  %s212_s30 = scalar_lea.vmem (!%p1251_p9), [#allocation2], %s475_s27 }
  0x82   : > { %p1252_p3 = scmp.ne.s32.totalorder (!%p1251_p9), %s1242_s24, 0 }
  0x87   : > { %793 = dma.done.wait (%p1252_p3), %s209_s26, 64  }
  0x88   : > { %795 = vsyncadd (%p1252_p3), %s209_s26, 4294967232  ;;  %p1253_p7 = scmp.eq.s32.totalorder %s936_s23, 0 }
  0x8a   : > { %797 = dma.done.wait (%p1253_p7), [#allocation6], 512   ;;  %p1254_p10 = pmov %p1253_p7 }
  0x8b   : > { %s223_s3 = sand.u32 1, %s814_s13   ;;  %p1255_p2 = scmp.ne.s32.totalorder %s1248_s10, 0 }
  0x8c   : > { %799 = vsyncadd (%p1254_p10), [#allocation6], 4294966784  ;;  %s477_s25 = sshll.u32 %s223_s3, 3 }
  0x8d   : > { %s225_s29 = scalar_lea.vmem [#allocation7], %s477_s25 }
  0x8e   : > { %801 = dma.done.wait (%p1255_p2), %s209_s26, 128  }
  0x8f   : > { %803 = vsyncadd (%p1255_p2), %s209_s26, 4294967168  ;;  %v857_v0 = vmov 0.0   ;;  %vm858_vm0 = vmmov 0   ;;  %v628_v1 = vld [vmem:[#allocation5] sm:$0xff]   ;;  %s1256_s24 = sld [smem:[#allocation13_spill]]  ;;  %v629_v2 = vld [vmem:[#allocation5 + $0x8] sm:$0xff]  }
  0x90   : > { %494 = vmatprep.subr.bf16.mxu0 %v857_v0  ;;  %502 = vmatprep.mubr.msk.bf16.mxu0 %vm858_vm0, %v857_v0  ;;  %v630_v3 = vld [vmem:[#allocation5 + $0x10] sm:$0xff]   ;;  %v631_v4 = vld [vmem:[#allocation5 + $0x18] sm:$0xff]   ;;  %vm288_vm1 = vcmask 523264   ;;  %s478_s23 = sshll.u32 %s1126_s0, 3  ;;  %s485_s10 = sshll.u32 %s834_s18, 1  ;;  %v263_v6 = vld [vmem:[%s225_s29] sm:$0xff] }
  0x91   : > { %495 = vmatpush3.bf16.msra.mxu0 %v628_v1  ;;  %v254_v5 = vld [vmem:[%s212_s30] sm:$0xf]  ;;  %s1257_s28 = sld [smem:[#allocation16_spill]]  ;;  %s252_s9 = scalar_lea.vmem [#allocation8], %s478_s23 }
  0x92   : > { %496 = vmatprep.subr.bf16.mxu0 %v857_v0  ;;  %s349_s11 = sshll.u32 %s252_s9, 4  ;;  %s1258_s4 = sld [smem:[#allocation19_spill]]  ;;  %s1150_s11 = int_to_ptr.vmem [resolvable:$true] %s349_s11 }
  0x93   : > { %s334_s18 = scalar_lea.sflag [#allocation4], %s1126_s0  ;;  %s720_s26 = scalar_lea.vmem %s1150_s11, 128 }
  0x94   : > { %p721_p5 = scmp.ne.s32.totalorder %s1150_s11, %s720_s26  ;;  %s859_s30 = smov [#allocation8]  }
  0x95   : > { %497 = vmatpush3.bf16.msra.mxu0 %v629_v2  ;;  %s345_s12 = sadd.s32 %s1256_s24, %s485_s10  ;;  %s724_s3 = sshll.u32 %s859_s30, 4  ;;  %s725_s3 = int_to_ptr.vmem [resolvable:$false] %s724_s3 }
  0x96   : > { %498 = vmatprep.subr.bf16.mxu0 %v857_v0  ;;  %s486_s7 = sshll.u32 %s345_s12, 7  ;;  %s726_s25 = scalar_lea.vmem %s725_s3, 256 }
  0x97   : > { %p1259_p6 = scmp.ne.s32.totalorder %s1257_s28, 0  ;;  %p727_p13 = scmp.lt.s32.totalorder %s1150_s11, %s725_s3 }
  0x98   : > { %s1148_s27 = scalar_lea.hbm %s1258_s4, %s486_s7  ;;  %p728_p12 = scmp.lt.s32.totalorder %s726_s25, %s720_s26 }
  0x99   : > { %499 = vmatpush3.bf16.msra.mxu0 %v630_v3  ;;  %p722_p0 = pnand %p721_p5, %p1259_p6 }
  0x9a   : > { %500 = vmatprep.subr.bf16.mxu0 %v857_v0  ;;  %p729_p1 = por %p728_p12, %p727_p13 }
  0x9b   : > { %p723_p4 = pneg %p722_p0 }
  0x9d   : > { %501 = vmatpush3.bf16.msra.mxu0 %v631_v4  ;;  %p730_p8 = pnand %p729_p1, %p723_p4 }
  0xa0   : > { %503 = vmatmul.mubr.msk.bf16.vlgmr.msra.gmra.mrb[0].mxu0 %vm288_vm1, %v254_v5 }
 0x173   : > { %v326_v7 = vpop.f32.mrb[0].mxu0 }
 0x174   : > { %v327_v8 = vadd.f32 %v326_v7, %v263_v6  ;;  %v504_v9 = vpop.f32.mrb[1].mxu0 }
 0x175   : > { %v329_v10 = vpop.f32.mrb[2].mxu0 }
 0x176   : > { %332 = vst [vmem:[%s252_s9] sm:$0xff] %v327_v8  ;;  %v505_v11 = vpop.f32.mrb[3].mxu0 }
 0x177   : > { %733 = shalt.err (!%p730_p8)
}
 0x178   : > { %s734_s0 = scalar_lea.hbm %s1148_s27, 128  ;;  %s738_s23 = scalar_lea.hbm %s1258_s4, 512 }
 0x179   : > { %p735_p11 = scmp.ne.s32.totalorder %s1148_s27, %s734_s0  ;;  %p739_p7 = scmp.lt.u32.totalorder %s1148_s27, %s1258_s4 }
 0x17a   : > { %p740_p10 = scmp.lt.u32.totalorder %s738_s23, %s734_s0  ;;  %p742_p5 = scmp.lt.u32.totalorder %s734_s0, %s1148_s27 }
 0x17b   : > { %p736_p9 = pnand %p735_p11, %p1259_p6 }
 0x17c   : > { %p741_p2 = por %p740_p10, %p739_p7 }
 0x17d   : > { %p737_p3 = pneg %p736_p9 }
 0x17e   : > { %p743_p0 = por %p742_p5, %p741_p2 }
 0x180   : > { %p744_p4 = pnand %p743_p0, %p737_p3 }
 0x182   : > { %747 = shalt.err (!%p744_p4)
}
 0x183   : > { %514 = dma.vmem_to_hbm [thread:$0]  (%p1259_p6), %s1150_s11, 128, %s1148_s27, %s334_s18  }
 0x184 PF: > { %s1260_s7 = sld [smem:[#allocation17_spill]]  ;;  %p534_p13 = scmp.ge.s32.totalorder %s850_s22, 2 }
 0x185   : > { %s361_s9 = sand.u32 1, %s822_s15  }
 0x186   : > { %s362_s19 = scalar_lea.sflag [#allocation4], %s361_s9 }
 0x18a   : > { %p1261_p12 = scmp.ne.s32.totalorder %s1260_s7, 0 }
 0x18c   : > { %p528_p1 = pnand %p534_p13, %p1261_p12 }
 0x18e   : > { %805 = dma.done.wait (!%p528_p1), %s362_s19, 128  }
 0x18f   : > { %807 = vsyncadd (!%p528_p1), %s362_s19, 4294967168  ;;  %s20_s22 = sadd.s32 1, %s850_s22   ;;  %s1262_s28 = sld [smem:[#allocation14_spill]] }
 0x190   : > { %p17_p8 = scmp.ge.s32.totalorder %s20_s22, 6   ;;  %s1263_s11 = sld [smem:[#allocation15_spill]] }
 0x191   : > { %s1264_s12 = smov %s814_s13  ;;  %s1265_s13 = smov %s818_s14 }
 0x192   : > { %s1266_s14 = smov %s1073_s6  ;;  %s1267_s15 = smov %s826_s16 }
 0x193   : > { %s1268_s16 = smov %s830_s17  ;;  %s1269_s17 = smov %s981_s8 }
 0x194   : > { %s1270_s18 = smov %s842_s20  ;;  %s1271_s19 = smov %s846_s21 }
 0x195   : > { %s1272_s20 = smov %s1262_s28  ;;  %19 = sbr.rel (!%p17_p8) target bundleno = 13 (0xd), region = 92 }
 0x196   : > { %s1273_s21 = smov %s1263_s11 }
 0x19c   :  { %367 = vsyncpa [#allocation3], 1 }
 0x19d   :  { %369 = vsyncpa [#allocation3 + $0x1], 1 }
 0x19e   :  { %370 = vsyncpa [#allocation6], 1 }
 0x19f   :  { %371 = vsyncpa [#allocation4], 1 }
 0x1a0   :  { %373 = vsyncpa [#allocation4 + $0x1], 1 }

</bundles_post_ra>
